<compile_context>
chip_gen: v7x
topology: tpu7x:2x2x1
jax: 0.10.0
libtpu: 0.0.40
codegen_flags: <defaults>
</compile_context>

<pallas_src>
import numpy as np
import jax
import jax.numpy as jnp
from jax.experimental import pallas as pl
from jax.experimental.pallas import tpu as pltpu

F32 = jnp.float32
BF16 = jnp.bfloat16
LN_EPS = 1e-5  # torch.nn.LayerNorm default


def _round_up(v, m):
    return ((v + m - 1) // m) * m


def _ln(x, gamma, beta):
    mu = jnp.mean(x, axis=-1, keepdims=True)
    var = jnp.mean((x - mu) ** 2, axis=-1, keepdims=True)
    return (x - mu) * jax.lax.rsqrt(var + LN_EPS) * gamma + beta


# ----------------------------------------------------------------------------- GATv2 layer kernel
# Grid over edge tiles ("arbitrary" reduction axis); node-level accumulators
# (softmax numerator / denominator, projections) live in VMEM scratch.

def make_gat_kernel(H, C):
    HC = H * C

    def kernel(x_ref, S_ref, D_ref, Wall_ref, ball_ref, attB_ref, Gt_ref,
               bias_ref, gamma_ref, beta_ref, o_ref,
               proj_sc, num_sc, den_sc, m_sc):
        t = pl.program_id(0)

        @pl.when(t == 0)
        def _init():
            # fused lin_l | lin_r | res projection, computed once per layer
            proj_sc[...] = (jnp.dot(x_ref[...], Wall_ref[...],
                                    preferred_element_type=F32) + ball_ref[...])
            num_sc[...] = jnp.zeros(num_sc.shape, F32)
            den_sc[...] = jnp.zeros(den_sc.shape, F32)
            m_sc[...] = jnp.full(m_sc.shape, -1e30, F32)

        xl = proj_sc[:, :HC]            # lin_l(x)
        xr = proj_sc[:, HC:2 * HC]      # lin_r(x)

        S = S_ref[...].astype(F32)      # (tE, Np) one-hot src (bf16 in HBM/VMEM)
        D = D_ref[...].astype(F32)      # (tE, Np) one-hot dst
        xj = jnp.dot(S, xl, preferred_element_type=F32)   # (tE, HC) gather src
        xi = jnp.dot(D, xr, preferred_element_type=F32)   # (tE, HC) gather dst
        pre = xi + xj
        pre = jnp.where(pre > 0, pre, 0.2 * pre)           # LeakyReLU(0.2)

        Gt = Gt_ref[...]                                   # (H, HC) head expander
        score = jnp.dot(pre, attB_ref[...],
                        preferred_element_type=F32)        # (tE, H) all heads at once

        # online (flash-style) segment softmax: running per-head shift m,
        # per-node numerator/denominator accumulators.
        tile_max = jnp.max(score, axis=0, keepdims=True)   # (1, H)
        m_new = jnp.maximum(m_sc[...], tile_max)
        scale = jnp.exp(m_sc[...] - m_new)                 # (1, H)
        ex = jnp.exp(score - m_new)                        # (tE, H)

        w = jnp.dot(ex, Gt, preferred_element_type=F32) * xj          # (tE, HC)
        num_sc[...] = (num_sc[...] * jnp.dot(scale, Gt, preferred_element_type=F32)
                       + jax.lax.dot_general(D, w, (((0,), (0,)), ((), ())),
                                             preferred_element_type=F32))
        den_sc[...] = (den_sc[...] * scale
                       + jax.lax.dot_general(D, ex, (((0,), (0,)), ((), ())),
                                             preferred_element_type=F32))
        m_sc[...] = m_new

        @pl.when(t == pl.num_programs(0) - 1)
        def _finalize():
            den_hc = jnp.dot(den_sc[...], Gt_ref[...], preferred_element_type=F32)
            agg = num_sc[...] / jnp.maximum(den_hc, 1e-20)   # guard padded nodes
            out = agg + proj_sc[:, 2 * HC:] + bias_ref[...]  # residual proj + bias
            out = _ln(out, gamma_ref[...], beta_ref[...])
            o_ref[...] = jnp.maximum(out, 0.0)

    return kernel


def gat_layer(x_pad, S, D, p, H, C, tE):
    HC = H * C
    N_pad, Fin = x_pad.shape
    Ep_pad = S.shape[0]

    Wall = jnp.concatenate([p['Wl'], p['Wr'], p['Wres']], axis=1)          # (Fin, 3HC)
    ball = jnp.concatenate([p['bl'], p['br'], jnp.zeros((1, HC), F32)], axis=1)
    attB = (p['att'][:, :, None] * jnp.eye(H, dtype=F32)[:, None, :]).reshape(HC, H)
    Gt = jnp.repeat(jnp.eye(H, dtype=F32), C, axis=1)                      # (H, HC)

    const = lambda t: (0, 0)
    in_specs = [
        pl.BlockSpec((N_pad, Fin), const),
        pl.BlockSpec((tE, N_pad), lambda t: (t, 0)),
        pl.BlockSpec((tE, N_pad), lambda t: (t, 0)),
        pl.BlockSpec(Wall.shape, const),
        pl.BlockSpec(ball.shape, const),
        pl.BlockSpec(attB.shape, const),
        pl.BlockSpec(Gt.shape, const),
        pl.BlockSpec(p['bias'].shape, const),
        pl.BlockSpec(p['gamma'].shape, const),
        pl.BlockSpec(p['beta'].shape, const),
    ]
    return pl.pallas_call(
        make_gat_kernel(H, C),
        out_shape=jax.ShapeDtypeStruct((N_pad, HC), F32),
        grid=(Ep_pad // tE,),
        in_specs=in_specs,
        out_specs=pl.BlockSpec((N_pad, HC), const),
        scratch_shapes=[pltpu.VMEM((N_pad, 3 * HC), F32),   # proj
                        pltpu.VMEM((N_pad, HC), F32),       # numerator
                        pltpu.VMEM((N_pad, H), F32),        # denominator
                        pltpu.VMEM((1, H), F32)],           # running max
        compiler_params=pltpu.CompilerParams(dimension_semantics=("arbitrary",)),
    )(x_pad, S, D, Wall, ball, attB, Gt, p['bias'], p['gamma'], p['beta'])


# ----------------------------------------------------------------------------- node post-process
# scatter_mean(x[dst], src) -> Linear -> ReLU -> Linear, then xc = [x | x_local]

def node_post_kernel(x_ref, S0_ref, D0_ref, cnt_ref, W1_ref, b1_ref, W2_ref, b2_ref, o_ref):
    x = x_ref[...]
    S0 = S0_ref[...].astype(F32)
    D0 = D0_ref[...].astype(F32)
    xd = jnp.dot(D0, x, preferred_element_type=F32)                       # x[dst]
    sums = jax.lax.dot_general(S0, xd, (((0,), (0,)), ((), ())),
                               preferred_element_type=F32)                # scatter-sum on src
    mean = sums / jnp.maximum(cnt_ref[...], 1.0)
    h = jnp.maximum(jnp.dot(mean, W1_ref[...], preferred_element_type=F32) + b1_ref[...], 0.0)
    xl = jnp.dot(h, W2_ref[...], preferred_element_type=F32) + b2_ref[...]
    HC = x.shape[1]
    o_ref[:, :HC] = x
    o_ref[:, HC:] = xl


# ----------------------------------------------------------------------------- fused edge pipeline
# in-kernel src/dst gather + edge_init + all edge_updater blocks + edge_out,
# tiled over edges, one pallas_call.

def make_edge_pipeline_kernel(n_upd):
    def kernel(*refs):
        xc_ref, S_ref, D_ref = refs[0], refs[1], refs[2]
        idx = 3
        Wsa, Wsb, Wsd, b1, W2, b2 = refs[idx:idx + 6]; idx += 6
        upd = []
        for _ in range(n_upd):
            upd.append(refs[idx:idx + 8]); idx += 8
        Wo1, bo1, Wo2, bo2 = refs[idx:idx + 4]; idx += 4
        o_ref = refs[idx]

        xc = xc_ref[...]
        S = S_ref[...].astype(F32)
        D = D_ref[...].astype(F32)
        xs = jnp.dot(S, xc, preferred_element_type=F32)   # x_combined[src]
        xd = jnp.dot(D, xc, preferred_element_type=F32)   # x_combined[dst]

        # concat([s, d, s-d, s*d]) @ W1  ==  s@(W1a+W1c) + d@(W1b-W1c) + (s*d)@W1d
        h = (jnp.dot(xs, Wsa[...], preferred_element_type=F32)
             + jnp.dot(xd, Wsb[...], preferred_element_type=F32)
             + jnp.dot(xs * xd, Wsd[...], preferred_element_type=F32)
             + b1[...])
        h = jnp.maximum(h, 0.0)                           # Dropout = identity (eval)
        ef = jnp.dot(h, W2[...], preferred_element_type=F32) + b2[...]

        for (Wa, ba, g1, bt1, Wb, bb, g2, bt2) in upd:
            t = jnp.maximum(jnp.dot(ef, Wa[...], preferred_element_type=F32) + ba[...], 0.0)
            t = _ln(t, g1[...], bt1[...])
            t = jnp.dot(t, Wb[...], preferred_element_type=F32) + bb[...]
            t = _ln(t, g2[...], bt2[...])
            ef = ef + t

        h2 = jnp.maximum(jnp.dot(ef, Wo1[...], preferred_element_type=F32) + bo1[...], 0.0)
        o_ref[...] = jnp.dot(h2, Wo2[...], preferred_element_type=F32) + bo2[...]
    return kernel


def edge_pipeline(xc, S0, D0, params, E, tEe, out_dim):
    E_pad, N_pad = S0.shape
    Dc = xc.shape[1]
    ei = params['edge_init']
    eo = params['edge_out']
    W1 = ei['W1']
    W1a, W1b, W1c, W1d = W1[:Dc], W1[Dc:2 * Dc], W1[2 * Dc:3 * Dc], W1[3 * Dc:]
    weights = [W1a + W1c, W1b - W1c, W1d, ei['b1'], ei['W2'], ei['b2']]
    for p in params['upd']:
        weights += [p['Wa'], p['ba'], p['g1'], p['bt1'], p['Wb'], p['bb'], p['g2'], p['bt2']]
    weights += [eo['W1'], eo['b1'], eo['W2'], eo['b2']]

    const = lambda e: (0, 0)
    in_specs = ([pl.BlockSpec(xc.shape, const),
                 pl.BlockSpec((tEe, N_pad), lambda e: (e, 0)),
                 pl.BlockSpec((tEe, N_pad), lambda e: (e, 0))]
                + [pl.BlockSpec(w.shape, const) for w in weights])

    out = pl.pallas_call(
        make_edge_pipeline_kernel(len(params['upd'])),
        out_shape=jax.ShapeDtypeStruct((E_pad, out_dim), F32),
        grid=(E_pad // tEe,),
        in_specs=in_specs,
        out_specs=pl.BlockSpec((tEe, out_dim), lambda e: (e, 0)),
        compiler_params=pltpu.CompilerParams(dimension_semantics=("parallel",)),
    )(xc, S0, D0, *weights)
    return out[:E]


# ----------------------------------------------------------------------------- helpers

def _pcall(kernel, out_shape, *args):
    spec = pl.BlockSpec(memory_space=pltpu.MemorySpace.VMEM)
    return pl.pallas_call(kernel, out_shape=out_shape,
                          in_specs=[spec] * len(args),
                          out_specs=pl.BlockSpec(memory_space=pltpu.MemorySpace.VMEM))(*args)


def _pad_idx(idx, length, sentinel):
    out = np.full((length,), sentinel, dtype=np.int32)
    out[:idx.shape[0]] = idx
    return jnp.asarray(out)


def _one_hot(idx, n):
    # bf16 one-hot (0/1 exact) built on device; sentinel index -> all-zero row.
    return (idx[:, None] == jnp.arange(n, dtype=jnp.int32)[None, :]).astype(BF16)


# ----------------------------------------------------------------------------- params

def init_params(key, node_in, nh, heads, lc_dim, eh, n_node_layers, n_edge_layers, out_dim):
    HC = nh * heads
    keys = iter(jax.random.split(key, 256))

    def w(shape, scale=0.1):
        return (scale * jax.random.normal(next(keys), shape)).astype(F32)

    gat = []
    for i in range(n_node_layers):
        fin = node_in if i == 0 else HC
        gat.append(dict(
            Wl=w((fin, HC)), bl=w((1, HC), 0.01),
            Wr=w((fin, HC)), br=w((1, HC), 0.01),
            att=w((heads, nh)),
            Wres=w((fin, HC)), bias=w((1, HC), 0.01),
            gamma=(1.0 + w((1, HC))).astype(F32), beta=w((1, HC), 0.01)))
    Dc = HC + lc_dim
    params = dict(
        gat=gat,
        lc=dict(W1=w((HC, lc_dim)), b1=w((1, lc_dim), 0.01),
                W2=w((lc_dim, lc_dim)), b2=w((1, lc_dim), 0.01)),
        edge_init=dict(W1=w((4 * Dc, eh)), b1=w((1, eh), 0.01),
                       W2=w((eh, eh)), b2=w((1, eh), 0.01)),
        upd=[dict(Wa=w((eh, eh)), ba=w((1, eh), 0.01),
                  g1=(1.0 + w((1, eh))).astype(F32), bt1=w((1, eh), 0.01),
                  Wb=w((eh, eh)), bb=w((1, eh), 0.01),
                  g2=(1.0 + w((1, eh))).astype(F32), bt2=w((1, eh), 0.01))
             for _ in range(n_edge_layers)],
        edge_out=dict(W1=w((eh, eh)), b1=w((1, eh), 0.01),
                      W2=w((eh, out_dim)), b2=w((1, out_dim), 0.01)))
    return params


# ----------------------------------------------------------------------------- forward (Pallas)

def pallas_forward(x, src, dst, params, H, C, lc_dim, eh, out_dim):
    N = x.shape[0]
    E = src.shape[0]
    HC = H * C

    # GATv2Conv(add_self_loops=True): remove existing self loops, append one per node.
    keep = src != dst
    s2 = np.concatenate([src[keep], np.arange(N)]).astype(np.int32)
    d2 = np.concatenate([dst[keep], np.arange(N)]).astype(np.int32)
    Ep = s2.shape[0]

    N_pad = _round_up(N, 8)
    tE = 256 if Ep > 256 else _round_up(Ep, 8)
    Ep_pad = _round_up(Ep, tE)
    tEe = 256 if E > 256 else _round_up(E, 8)
    E_pad = _round_up(E, tEe)

    # one-hot gather/scatter matrices (bf16, device-built); padded rows are zero.
    S = _one_hot(_pad_idx(s2, Ep_pad, N_pad), N_pad)     # (Ep_pad, N_pad) src, w/ self loops
    D = _one_hot(_pad_idx(d2, Ep_pad, N_pad), N_pad)     # (Ep_pad, N_pad) dst, w/ self loops
    S0 = _one_hot(_pad_idx(src, E_pad, N_pad), N_pad)    # (E_pad, N_pad)  original edges
    D0 = _one_hot(_pad_idx(dst, E_pad, N_pad), N_pad)
    cnt = jnp.sum(S0.astype(F32), axis=0)[:, None]       # (N_pad, 1) out-degree

    x_pad = jnp.zeros((N_pad, x.shape[1]), F32).at[:N].set(x)

    for p in params['gat']:
        x_pad = gat_layer(x_pad, S, D, p, H, C, tE)

    # local context + concat -> xc, gridless (small node-level work)
    lc = params['lc']
    xc = _pcall(node_post_kernel, jax.ShapeDtypeStruct((N_pad, HC + lc_dim), F32),
                x_pad, S0, D0, cnt, lc['W1'], lc['b1'], lc['W2'], lc['b2'])

    # fused edge pipeline (gather + init + updaters + head), tiled over edges
    return edge_pipeline(xc, S0, D0, params, E, tEe, out_dim)


# ----------------------------------------------------------------------------- pure-JAX reference

def ref_forward(x, src, dst, params, H, C):
    N = x.shape[0]
    HC = H * C
    src_j = jnp.asarray(src)
    dst_j = jnp.asarray(dst)
    keep = src != dst
    s2 = jnp.asarray(np.concatenate([src[keep], np.arange(N)]).astype(np.int32))
    d2 = jnp.asarray(np.concatenate([dst[keep], np.arange(N)]).astype(np.int32))
    Ep = s2.shape[0]

    for p in params['gat']:
        xl = x @ p['Wl'] + p['bl']
        xr = x @ p['Wr'] + p['br']
        xj = xl[s2].reshape(Ep, H, C)
        xi = xr[d2].reshape(Ep, H, C)
        pre = xi + xj
        pre = jnp.where(pre > 0, pre, 0.2 * pre)
        score = jnp.sum(pre * p['att'][None], axis=-1)               # (Ep, H)
        mx = jax.ops.segment_max(score, d2, num_segments=N)
        ex = jnp.exp(score - mx[d2])
        den = jax.ops.segment_sum(ex, d2, num_segments=N)
        alpha = ex / den[d2]
        msg = (xj * alpha[:, :, None]).reshape(Ep, HC)
        out = jax.ops.segment_sum(msg, d2, num_segments=N)
        out = out + x @ p['Wres'] + p['bias']
        out = _ln(out, p['gamma'], p['beta'])
        x = jnp.maximum(out, 0.0)

    lc = params['lc']
    sums = jax.ops.segment_sum(x[dst_j], src_j, num_segments=N)
    cnt = jax.ops.segment_sum(jnp.ones((src_j.shape[0], 1), F32), src_j, num_segments=N)
    mean = sums / jnp.maximum(cnt, 1.0)
    x_local = jnp.maximum(mean @ lc['W1'] + lc['b1'], 0.0) @ lc['W2'] + lc['b2']

    xc = jnp.concatenate([x, x_local], axis=-1)
    xs, xd = xc[src_j], xc[dst_j]
    ef = jnp.concatenate([xs, xd, xs - xd, xs * xd], axis=-1)
    ei = params['edge_init']
    h = jnp.maximum(ef @ ei['W1'] + ei['b1'], 0.0) @ ei['W2'] + ei['b2']
    for p in params['upd']:
        t = jnp.maximum(h @ p['Wa'] + p['ba'], 0.0)
        t = _ln(t, p['g1'], p['bt1'])
        t = t @ p['Wb'] + p['bb']
        t = _ln(t, p['g2'], p['bt2'])
        h = h + t
    eo = params['edge_out']
    return jnp.maximum(h @ eo['W1'] + eo['b1'], 0.0) @ eo['W2'] + eo['b2']


# ----------------------------------------------------------------------------- main

if __name__ == "__main__":
    N, E = 12, 24
    node_in_dim = 16
    node_hidden_dim = 8
    heads = 4
    local_context_dim = 16
    edge_hidden_dim = 32
    num_node_layers = 2
    num_edge_layers = 2
    out_dim = 1

    key = jax.random.PRNGKey(0)
    k_x, k_s, k_d, k_p = jax.random.split(key, 4)
    x = (0.5 * jax.random.normal(k_x, (N, node_in_dim))).astype(F32)
    src = np.asarray(jax.random.randint(k_s, (E,), 0, N), dtype=np.int32)
    dst = np.asarray(jax.random.randint(k_d, (E,), 0, N), dtype=np.int32)

    params = init_params(k_p, node_in_dim, node_hidden_dim, heads,
                         local_context_dim, edge_hidden_dim,
                         num_node_layers, num_edge_layers, out_dim)

    out = pallas_forward(x, src, dst, params, heads, node_hidden_dim,
                         local_context_dim, edge_hidden_dim, out_dim)
    out = jax.block_until_ready(out)

    ref = ref_forward(x, src, dst, params, heads, node_hidden_dim)
    np.testing.assert_allclose(np.asarray(out), np.asarray(ref), rtol=5e-4, atol=5e-4)
    print("KERNEL_OK")
</pallas_src>

<mosaic_0001>
module attributes {stable_mosaic.version = 11 : i64} {
  func.func @kernel(%arg0: i32, %arg1: memref<16x16xf32, #tpu.memory_space<vmem>>, %arg2: memref<32x16xbf16, #tpu.memory_space<vmem>>, %arg3: memref<32x16xbf16, #tpu.memory_space<vmem>>, %arg4: memref<16x96xf32, #tpu.memory_space<vmem>>, %arg5: memref<1x96xf32, #tpu.memory_space<vmem>>, %arg6: memref<32x4xf32, #tpu.memory_space<vmem>>, %arg7: memref<4x32xf32, #tpu.memory_space<vmem>>, %arg8: memref<1x32xf32, #tpu.memory_space<vmem>>, %arg9: memref<1x32xf32, #tpu.memory_space<vmem>>, %arg10: memref<1x32xf32, #tpu.memory_space<vmem>>, %arg11: memref<16x32xf32, #tpu.memory_space<vmem>>, %arg12: memref<16x96xf32, #tpu.memory_space<vmem>>, %arg13: memref<16x32xf32, #tpu.memory_space<vmem>>, %arg14: memref<16x4xf32, #tpu.memory_space<vmem>>, %arg15: memref<1x4xf32, #tpu.memory_space<vmem>>) attributes {dimension_semantics = [#tpu.dimension_semantics<arbitrary>], iteration_bounds = array<i64: 1>, scalar_prefetch = 0 : i64, scratch_operands = 4 : i64, tpu.core_type = #tpu.core_type<tc>, window_params = [{pipeline_mode = #tpu.pipeline_mode<synchronous>, transform_indices = @transform_0, window_bounds = array<i64: 16, 16>}, {transform_indices = @transform_1, window_bounds = array<i64: 32, 16>}, {transform_indices = @transform_2, window_bounds = array<i64: 32, 16>}, {pipeline_mode = #tpu.pipeline_mode<synchronous>, transform_indices = @transform_3, window_bounds = array<i64: 16, 96>}, {pipeline_mode = #tpu.pipeline_mode<synchronous>, transform_indices = @transform_4, window_bounds = array<i64: 1, 96>}, {pipeline_mode = #tpu.pipeline_mode<synchronous>, transform_indices = @transform_5, window_bounds = array<i64: 32, 4>}, {pipeline_mode = #tpu.pipeline_mode<synchronous>, transform_indices = @transform_6, window_bounds = array<i64: 4, 32>}, {pipeline_mode = #tpu.pipeline_mode<synchronous>, transform_indices = @transform_7, window_bounds = array<i64: 1, 32>}, {pipeline_mode = #tpu.pipeline_mode<synchronous>, transform_indices = @transform_8, window_bounds = array<i64: 1, 32>}, {pipeline_mode = #tpu.pipeline_mode<synchronous>, transform_indices = @transform_9, window_bounds = array<i64: 1, 32>}, {pipeline_mode = #tpu.pipeline_mode<synchronous>, transform_indices = @transform_10, window_bounds = array<i64: 16, 32>}]} {
    %c0_i32 = arith.constant 0 : i32
    %0 = arith.cmpi eq, %arg0, %c0_i32 : i32
    %1 = arith.extui %0 : i1 to i32
    %c0_i32_0 = arith.constant 0 : i32
    %2 = arith.cmpi ne, %1, %c0_i32_0 : i32
    scf.if %2 {
      %c0_36 = arith.constant 0 : index
      %c0_37 = arith.constant 0 : index
      %49 = vector.load %arg1[%c0_36, %c0_37] : memref<16x16xf32, #tpu.memory_space<vmem>>, vector<16x16xf32>
      %c0_38 = arith.constant 0 : index
      %c0_39 = arith.constant 0 : index
      %50 = vector.load %arg4[%c0_38, %c0_39] : memref<16x96xf32, #tpu.memory_space<vmem>>, vector<16x96xf32>
      %cst_40 = arith.constant dense<0.000000e+00> : vector<16x96xf32>
      %51 = tpu.matmul %49, %50, %cst_40 {dimension_numbers = #tpu.dot_dimension_numbers<[1], [0], [0], [1], [0, 0, 1, 1], [], []>} : vector<16x16xf32>, vector<16x96xf32>, vector<16x96xf32> -> vector<16x96xf32>
      %c0_41 = arith.constant 0 : index
      %c0_42 = arith.constant 0 : index
      %52 = vector.load %arg5[%c0_41, %c0_42] : memref<1x96xf32, #tpu.memory_space<vmem>>, vector<1x96xf32>
      %53 = vector.broadcast %52 : vector<1x96xf32> to vector<16x96xf32>
      %54 = arith.addf %51, %53 : vector<16x96xf32>
      %c0_43 = arith.constant 0 : index
      %c0_44 = arith.constant 0 : index
      %55 = vector.load %arg12[%c0_43, %c0_44] : memref<16x96xf32, #tpu.memory_space<vmem>>, vector<16x96xf32>
      tpu.vector_store %arg12[%c0_43, %c0_44], %54 {strides = array<i32>} : memref<16x96xf32, #tpu.memory_space<vmem>>, vector<16x96xf32>,
      %cst_45 = arith.constant 0.000000e+00 : f32
      %56 = vector.broadcast %cst_45 : f32 to vector<16x32xf32>
      %c0_46 = arith.constant 0 : index
      %c0_47 = arith.constant 0 : index
      %57 = vector.load %arg13[%c0_46, %c0_47] : memref<16x32xf32, #tpu.memory_space<vmem>>, vector<16x32xf32>
      tpu.vector_store %arg13[%c0_46, %c0_47], %56 {strides = array<i32>} : memref<16x32xf32, #tpu.memory_space<vmem>>, vector<16x32xf32>,
      %cst_48 = arith.constant 0.000000e+00 : f32
      %58 = vector.broadcast %cst_48 : f32 to vector<16x4xf32>
      %c0_49 = arith.constant 0 : index
      %c0_50 = arith.constant 0 : index
      %59 = vector.load %arg14[%c0_49, %c0_50] : memref<16x4xf32, #tpu.memory_space<vmem>>, vector<16x4xf32>
      tpu.vector_store %arg14[%c0_49, %c0_50], %58 {strides = array<i32>} : memref<16x4xf32, #tpu.memory_space<vmem>>, vector<16x4xf32>,
      %cst_51 = arith.constant -1.000000e+30 : f32
      %60 = vector.broadcast %cst_51 : f32 to vector<1x4xf32>
      %c0_52 = arith.constant 0 : index
      %c0_53 = arith.constant 0 : index
      %61 = vector.load %arg15[%c0_52, %c0_53] : memref<1x4xf32, #tpu.memory_space<vmem>>, vector<1x4xf32>
      tpu.vector_store %arg15[%c0_52, %c0_53], %60 {strides = array<i32>} : memref<1x4xf32, #tpu.memory_space<vmem>>, vector<1x4xf32>,
    } else {
    }
    %c0 = arith.constant 0 : index
    %c0_1 = arith.constant 0 : index
    %3 = vector.load %arg12[%c0, %c0_1] : memref<16x96xf32, #tpu.memory_space<vmem>>, vector<16x32xf32>
    %c0_2 = arith.constant 0 : index
    %c32 = arith.constant 32 : index
    %4 = vector.load %arg12[%c0_2, %c32] : memref<16x96xf32, #tpu.memory_space<vmem>>, vector<16x32xf32>
    %c0_3 = arith.constant 0 : index
    %c0_4 = arith.constant 0 : index
    %5 = vector.load %arg2[%c0_3, %c0_4] : memref<32x16xbf16, #tpu.memory_space<vmem>>, vector<32x16xbf16>
    %6 = arith.extf %5 : vector<32x16xbf16> to vector<32x16xf32>
    %c0_5 = arith.constant 0 : index
    %c0_6 = arith.constant 0 : index
    %7 = vector.load %arg3[%c0_5, %c0_6] : memref<32x16xbf16, #tpu.memory_space<vmem>>, vector<32x16xbf16>
    %8 = arith.extf %7 : vector<32x16xbf16> to vector<32x16xf32>
    %cst = arith.constant dense<0.000000e+00> : vector<32x32xf32>
    %9 = tpu.matmul %6, %3, %cst {dimension_numbers = #tpu.dot_dimension_numbers<[1], [0], [0], [1], [0, 0, 1, 1], [], []>} : vector<32x16xf32>, vector<16x32xf32>, vector<32x32xf32> -> vector<32x32xf32>
    %cst_7 = arith.constant dense<0.000000e+00> : vector<32x32xf32>
    %10 = tpu.matmul %8, %4, %cst_7 {dimension_numbers = #tpu.dot_dimension_numbers<[1], [0], [0], [1], [0, 0, 1, 1], [], []>} : vector<32x16xf32>, vector<16x32xf32>, vector<32x32xf32> -> vector<32x32xf32>
    %11 = arith.addf %10, %9 : vector<32x32xf32>
    %cst_8 = arith.constant 0.000000e+00 : f32
    %12 = vector.broadcast %cst_8 : f32 to vector<32x32xf32>
    %13 = arith.cmpf ogt, %11, %12 : vector<32x32xf32>
    %cst_9 = arith.constant 2.000000e-01 : f32
    %14 = vector.broadcast %cst_9 : f32 to vector<32x32xf32>
    %15 = arith.mulf %14, %11 : vector<32x32xf32>
    %16 = arith.select %13, %11, %15 : vector<32x32xi1>, vector<32x32xf32>
    %c0_10 = arith.constant 0 : index
    %c0_11 = arith.constant 0 : index
    %17 = vector.load %arg7[%c0_10, %c0_11] : memref<4x32xf32, #tpu.memory_space<vmem>>, vector<4x32xf32>
    %c0_12 = arith.constant 0 : index
    %c0_13 = arith.constant 0 : index
    %18 = vector.load %arg6[%c0_12, %c0_13] : memref<32x4xf32, #tpu.memory_space<vmem>>, vector<32x4xf32>
    %cst_14 = arith.constant dense<0.000000e+00> : vector<32x4xf32>
    %19 = tpu.matmul %16, %18, %cst_14 {dimension_numbers = #tpu.dot_dimension_numbers<[1], [0], [0], [1], [0, 0, 1, 1], [], []>} : vector<32x32xf32>, vector<32x4xf32>, vector<32x4xf32> -> vector<32x4xf32>
    %cst_15 = arith.constant dense<0xFF800000> : vector<4xf32>
    %20 = vector.multi_reduction <maximumf>, %19, %cst_15 [0] : vector<32x4xf32> to vector<4xf32>
    %21 = vector.shape_cast %20 : vector<4xf32> to vector<1x4xf32>
    %c0_16 = arith.constant 0 : index
    %c0_17 = arith.constant 0 : index
    %22 = vector.load %arg15[%c0_16, %c0_17] : memref<1x4xf32, #tpu.memory_space<vmem>>, vector<1x4xf32>
    %23 = arith.maximumf %22, %21 : vector<1x4xf32>
    %c0_18 = arith.constant 0 : index
    %c0_19 = arith.constant 0 : index
    %24 = vector.load %arg15[%c0_18, %c0_19] : memref<1x4xf32, #tpu.memory_space<vmem>>, vector<1x4xf32>
    %25 = arith.subf %24, %23 : vector<1x4xf32>
    %26 = math.exp %25 : vector<1x4xf32>
    %27 = vector.broadcast %23 : vector<1x4xf32> to vector<32x4xf32>
    %28 = arith.subf %19, %27 : vector<32x4xf32>
    %29 = math.exp %28 : vector<32x4xf32>
    %cst_20 = arith.constant dense<0.000000e+00> : vector<32x32xf32>
    %30 = tpu.matmul %29, %17, %cst_20 {dimension_numbers = #tpu.dot_dimension_numbers<[1], [0], [0], [1], [0, 0, 1, 1], [], []>} : vector<32x4xf32>, vector<4x32xf32>, vector<32x32xf32> -> vector<32x32xf32>
    %31 = arith.mulf %30, %9 : vector<32x32xf32>
    %c0_21 = arith.constant 0 : index
    %c0_22 = arith.constant 0 : index
    %32 = vector.load %arg13[%c0_21, %c0_22] : memref<16x32xf32, #tpu.memory_space<vmem>>, vector<16x32xf32>
    %cst_23 = arith.constant dense<0.000000e+00> : vector<1x32xf32>
    %33 = tpu.matmul %26, %17, %cst_23 {dimension_numbers = #tpu.dot_dimension_numbers<[1], [0], [0], [1], [0, 0, 1, 1], [], []>} : vector<1x4xf32>, vector<4x32xf32>, vector<1x32xf32> -> vector<1x32xf32>
    %34 = vector.broadcast %33 : vector<1x32xf32> to vector<16x32xf32>
    %35 = arith.mulf %32, %34 : vector<16x32xf32>
    %cst_24 = arith.constant dense<0.000000e+00> : vector<16x32xf32>
    %36 = tpu.matmul %8, %31, %cst_24 {dimension_numbers = #tpu.dot_dimension_numbers<[0], [0], [1], [1], [0, 1, 1, 1], [], []>} : vector<32x16xf32>, vector<32x32xf32>, vector<16x32xf32> -> vector<16x32xf32>
    %37 = arith.addf %35, %36 : vector<16x32xf32>
    %c0_25 = arith.constant 0 : index
    %c0_26 = arith.constant 0 : index
    %38 = vector.load %arg13[%c0_25, %c0_26] : memref<16x32xf32, #tpu.memory_space<vmem>>, vector<16x32xf32>
    tpu.vector_store %arg13[%c0_25, %c0_26], %37 {strides = array<i32>} : memref<16x32xf32, #tpu.memory_space<vmem>>, vector<16x32xf32>,
    %c0_27 = arith.constant 0 : index
    %c0_28 = arith.constant 0 : index
    %39 = vector.load %arg14[%c0_27, %c0_28] : memref<16x4xf32, #tpu.memory_space<vmem>>, vector<16x4xf32>
    %40 = vector.broadcast %26 : vector<1x4xf32> to vector<16x4xf32>
    %41 = arith.mulf %39, %40 : vector<16x4xf32>
    %cst_29 = arith.constant dense<0.000000e+00> : vector<16x4xf32>
    %42 = tpu.matmul %8, %29, %cst_29 {dimension_numbers = #tpu.dot_dimension_numbers<[0], [0], [1], [1], [0, 1, 1, 1], [], []>} : vector<32x16xf32>, vector<32x4xf32>, vector<16x4xf32> -> vector<16x4xf32>
    %43 = arith.addf %41, %42 : vector<16x4xf32>
    %c0_30 = arith.constant 0 : index
    %c0_31 = arith.constant 0 : index
    %44 = vector.load %arg14[%c0_30, %c0_31] : memref<16x4xf32, #tpu.memory_space<vmem>>, vector<16x4xf32>
    tpu.vector_store %arg14[%c0_30, %c0_31], %43 {strides = array<i32>} : memref<16x4xf32, #tpu.memory_space<vmem>>, vector<16x4xf32>,
    %c0_32 = arith.constant 0 : index
    %c0_33 = arith.constant 0 : index
    %45 = vector.load %arg15[%c0_32, %c0_33] : memref<1x4xf32, #tpu.memory_space<vmem>>, vector<1x4xf32>
    tpu.vector_store %arg15[%c0_32, %c0_33], %23 {strides = array<i32>} : memref<1x4xf32, #tpu.memory_space<vmem>>, vector<1x4xf32>,
    %c0_i32_34 = arith.constant 0 : i32
    %46 = arith.cmpi eq, %arg0, %c0_i32_34 : i32
    %47 = arith.extui %46 : i1 to i32
    %c0_i32_35 = arith.constant 0 : i32
    %48 = arith.cmpi ne, %47, %c0_i32_35 : i32
    scf.if %48 {
      %c0_36 = arith.constant 0 : index
      %c0_37 = arith.constant 0 : index
      %49 = vector.load %arg14[%c0_36, %c0_37] : memref<16x4xf32, #tpu.memory_space<vmem>>, vector<16x4xf32>
      %c0_38 = arith.constant 0 : index
      %c0_39 = arith.constant 0 : index
      %50 = vector.load %arg7[%c0_38, %c0_39] : memref<4x32xf32, #tpu.memory_space<vmem>>, vector<4x32xf32>
      %cst_40 = arith.constant dense<0.000000e+00> : vector<16x32xf32>
      %51 = tpu.matmul %49, %50, %cst_40 {dimension_numbers = #tpu.dot_dimension_numbers<[1], [0], [0], [1], [0, 0, 1, 1], [], []>} : vector<16x4xf32>, vector<4x32xf32>, vector<16x32xf32> -> vector<16x32xf32>
      %c0_41 = arith.constant 0 : index
      %c0_42 = arith.constant 0 : index
      %52 = vector.load %arg13[%c0_41, %c0_42] : memref<16x32xf32, #tpu.memory_space<vmem>>, vector<16x32xf32>
      %cst_43 = arith.constant 9.99999968E-21 : f32
      %53 = vector.broadcast %cst_43 : f32 to vector<16x32xf32>
      %54 = arith.maximumf %51, %53 : vector<16x32xf32>
      %55 = arith.divf %52, %54 : vector<16x32xf32>
      %c0_44 = arith.constant 0 : index
      %c64 = arith.constant 64 : index
      %56 = vector.load %arg12[%c0_44, %c64] : memref<16x96xf32, #tpu.memory_space<vmem>>, vector<16x32xf32>
      %57 = arith.addf %55, %56 : vector<16x32xf32>
      %c0_45 = arith.constant 0 : index
      %c0_46 = arith.constant 0 : index
      %58 = vector.load %arg8[%c0_45, %c0_46] : memref<1x32xf32, #tpu.memory_space<vmem>>, vector<1x32xf32>
      %59 = vector.broadcast %58 : vector<1x32xf32> to vector<16x32xf32>
      %60 = arith.addf %57, %59 : vector<16x32xf32>
      %c0_47 = arith.constant 0 : index
      %c0_48 = arith.constant 0 : index
      %61 = vector.load %arg9[%c0_47, %c0_48] : memref<1x32xf32, #tpu.memory_space<vmem>>, vector<1x32xf32>
      %c0_49 = arith.constant 0 : index
      %c0_50 = arith.constant 0 : index
      %62 = vector.load %arg10[%c0_49, %c0_50] : memref<1x32xf32, #tpu.memory_space<vmem>>, vector<1x32xf32>
      %cst_51 = arith.constant dense<0.000000e+00> : vector<16xf32>
      %63 = vector.multi_reduction <add>, %60, %cst_51 [1] : vector<16x32xf32> to vector<16xf32>
      %64 = vector.shape_cast %63 : vector<16xf32> to vector<16x1xf32>
      %cst_52 = arith.constant 3.200000e+01 : f32
      %65 = vector.broadcast %cst_52 : f32 to vector<16x1xf32>
      %66 = arith.divf %64, %65 : vector<16x1xf32>
      %67 = vector.broadcast %66 : vector<16x1xf32> to vector<16x32xf32>
      %68 = arith.subf %60, %67 : vector<16x32xf32>
      %69 = arith.mulf %68, %68 : vector<16x32xf32>
      %cst_53 = arith.constant dense<0.000000e+00> : vector<16xf32>
      %70 = vector.multi_reduction <add>, %69, %cst_53 [1] : vector<16x32xf32> to vector<16xf32>
      %71 = vector.shape_cast %70 : vector<16xf32> to vector<16x1xf32>
      %cst_54 = arith.constant 3.200000e+01 : f32
      %72 = vector.broadcast %cst_54 : f32 to vector<16x1xf32>
      %73 = arith.divf %71, %72 : vector<16x1xf32>
      %74 = vector.broadcast %66 : vector<16x1xf32> to vector<16x32xf32>
      %75 = arith.subf %60, %74 : vector<16x32xf32>
      %cst_55 = arith.constant 9.99999974E-6 : f32
      %76 = vector.broadcast %cst_55 : f32 to vector<16x1xf32>
      %77 = arith.addf %73, %76 : vector<16x1xf32>
      %78 = math.rsqrt %77 : vector<16x1xf32>
      %79 = vector.broadcast %78 : vector<16x1xf32> to vector<16x32xf32>
      %80 = arith.mulf %75, %79 : vector<16x32xf32>
      %81 = vector.broadcast %61 : vector<1x32xf32> to vector<16x32xf32>
      %82 = arith.mulf %80, %81 : vector<16x32xf32>
      %83 = vector.broadcast %62 : vector<1x32xf32> to vector<16x32xf32>
      %84 = arith.addf %82, %83 : vector<16x32xf32>
      %cst_56 = arith.constant 0.000000e+00 : f32
      %85 = vector.broadcast %cst_56 : f32 to vector<16x32xf32>
      %86 = arith.maximumf %84, %85 : vector<16x32xf32>
      %c0_57 = arith.constant 0 : index
      %c0_58 = arith.constant 0 : index
      %87 = vector.load %arg11[%c0_57, %c0_58] : memref<16x32xf32, #tpu.memory_space<vmem>>, vector<16x32xf32>
      tpu.vector_store %arg11[%c0_57, %c0_58], %86 {strides = array<i32>} : memref<16x32xf32, #tpu.memory_space<vmem>>, vector<16x32xf32>,
    } else {
    }
    return
  }
  func.func @transform_0(%arg0: i32) -> (i32, i32) {
    %c0_i32 = arith.constant 0 : i32
    %c0_i32_0 = arith.constant 0 : i32
    %c0_i32_1 = arith.constant 0 : i32
    return %c0_i32, %c0_i32_0 : i32, i32
  }
  func.func @transform_1(%arg0: i32) -> (i32, i32) {
    %c0_i32 = arith.constant 0 : i32
    %c0_i32_0 = arith.constant 0 : i32
    return %arg0, %c0_i32 : i32, i32
  }
  func.func @transform_2(%arg0: i32) -> (i32, i32) {
    %c0_i32 = arith.constant 0 : i32
    %c0_i32_0 = arith.constant 0 : i32
    return %arg0, %c0_i32 : i32, i32
  }
  func.func @transform_3(%arg0: i32) -> (i32, i32) {
    %c0_i32 = arith.constant 0 : i32
    %c0_i32_0 = arith.constant 0 : i32
    %c0_i32_1 = arith.constant 0 : i32
    return %c0_i32, %c0_i32_0 : i32, i32
  }
  func.func @transform_4(%arg0: i32) -> (i32, i32) {
    %c0_i32 = arith.constant 0 : i32
    %c0_i32_0 = arith.constant 0 : i32
    %c0_i32_1 = arith.constant 0 : i32
    return %c0_i32, %c0_i32_0 : i32, i32
  }
  func.func @transform_5(%arg0: i32) -> (i32, i32) {
    %c0_i32 = arith.constant 0 : i32
    %c0_i32_0 = arith.constant 0 : i32
    %c0_i32_1 = arith.constant 0 : i32
    return %c0_i32, %c0_i32_0 : i32, i32
  }
  func.func @transform_6(%arg0: i32) -> (i32, i32) {
    %c0_i32 = arith.constant 0 : i32
    %c0_i32_0 = arith.constant 0 : i32
    %c0_i32_1 = arith.constant 0 : i32
    return %c0_i32, %c0_i32_0 : i32, i32
  }
  func.func @transform_7(%arg0: i32) -> (i32, i32) {
    %c0_i32 = arith.constant 0 : i32
    %c0_i32_0 = arith.constant 0 : i32
    %c0_i32_1 = arith.constant 0 : i32
    return %c0_i32, %c0_i32_0 : i32, i32
  }
  func.func @transform_8(%arg0: i32) -> (i32, i32) {
    %c0_i32 = arith.constant 0 : i32
    %c0_i32_0 = arith.constant 0 : i32
    %c0_i32_1 = arith.constant 0 : i32
    return %c0_i32, %c0_i32_0 : i32, i32
  }
  func.func @transform_9(%arg0: i32) -> (i32, i32) {
    %c0_i32 = arith.constant 0 : i32
    %c0_i32_0 = arith.constant 0 : i32
    %c0_i32_1 = arith.constant 0 : i32
    return %c0_i32, %c0_i32_0 : i32, i32
  }
  func.func @transform_10(%arg0: i32) -> (i32, i32) {
    %c0_i32 = arith.constant 0 : i32
    %c0_i32_0 = arith.constant 0 : i32
    %c0_i32_1 = arith.constant 0 : i32
    return %c0_i32, %c0_i32_0 : i32, i32
  }
}

</mosaic_0001>

<bundles_post_ra>
// kernel: tpu_custom_call.1
= control target key start
LH: loop header
LB: loop body
LE: loop exit
PB: predicated region body
PF: predicated region fallthrough
CT: control target
= control target key end

     0   :  { %vm51_vm0 = vcmask 130048   ;;  %s1562_s0 = inlined_call_operand.vmem [shape: f32[16,16], index: 0, kind: input, shape index: {}]   ;;  %s1563_s1 = inlined_call_operand.vmem [shape: bf16[32,16], index: 1, kind: input, shape index: {}]   ;;  %s1564_s2 = inlined_call_operand.vmem [shape: bf16[32,16], index: 2, kind: input, shape index: {}]   ;;  %s1565_s3 = inlined_call_operand.vmem [shape: f32[16,96], index: 3, kind: input, shape index: {}]   ;;  %s1566_s4 = inlined_call_operand.vmem [shape: f32[1,96], index: 4, kind: input, shape index: {}]   ;;  %s1567_s5 = inlined_call_operand.vmem [shape: f32[32,4], index: 5, kind: input, shape index: {}]   ;;  %s1568_s6 = inlined_call_operand.vmem [shape: f32[4,32], index: 6, kind: input, shape index: {}]   ;;  %s1569_s7 = inlined_call_operand.vmem [shape: f32[1,32], index: 7, kind: input, shape index: {}]   ;;  %s1570_s8 = inlined_call_operand.vmem [shape: f32[1,32], index: 8, kind: input, shape index: {}]   ;;  %s1571_s9 = inlined_call_operand.vmem [shape: f32[1,32], index: 9, kind: input, shape index: {}]   ;;  %s1572_s10 = inlined_call_operand.hbm [shape: f32[16,32], index: 10, kind: output, shape index: {}]  }
   0x1   :  { %v42_v0 = vld [vmem:[%s1565_s3] sm:$0xff]  ;;  %v43_v1 = vld [vmem:[%s1565_s3 + $0x8] sm:$0xff] }
   0x2   :  { %v40_v2 = vld [vmem:[%s1562_s0] sm:$0xff]  ;;  %v1271_v3 = vpack.c.bf16 %v43_v1, %v42_v0 }
   0x3   :  { %1194 = vmatprep.mubr.msk.f32.mxu0 %vm51_vm0, %v40_v2 }
   0x4   :  { %15 = vsyncpa [#allocation7], 0  ;;  %1272 = vmatprep.subr.bf16.mxu0 %v1271_v3  ;;  %v41_v4 = vld [vmem:[%s1562_s0 + $0x8] sm:$0xff]  ;;  %v1094_v5 = vld [vmem:[%s1566_s4] ss:$0 sm:$0xff]  ;;  %vm133_vm1 = vcmask 785408  }
   0x5   :  { %1274 = vmatpush3.bf16.msra.mxu0 %v1271_v3  ;;  %v1127_v10 = vld [vmem:[%s1563_s1] sm:$0xff]   ;;  %s1362_s4 = smov 64   ;;  %v1142_v18 = vld [vmem:[%s1563_s1 + $0x8] sm:$0xff]   ;;  %s1363_s27 = smov 96   ;;  %v380_v33 = vld [vmem:[%s1567_s5 + $0x10] sm:$0xff]  ;;  %vm136_vm4 = vcmask 261120  }
   0x6   :  { %v1128_v11 = vunpack.c.l.bf16 %v1127_v10  ;;  %v1135_v12 = vld [vmem:[%s1564_s2] sm:$0xff]   ;;  %v1129_v19 = vunpack.c.h.bf16 %v1127_v10  ;;  %v1132_v20 = vunpack.c.l.bf16 %v1142_v18  ;;  %v1133_v21 = vunpack.c.h.bf16 %v1142_v18  ;;  %v1143_v23 = vld [vmem:[%s1564_s2 + $0x8] sm:$0xff]   ;;  %v381_v34 = vld [vmem:[%s1567_s5 + $0x18] sm:$0xff]  ;;  %s1367_s3 = smov [#allocation6]  }
   0x7   :  { %v1136_v13 = vunpack.c.l.bf16 %v1135_v12  ;;  %v1137_v22 = vunpack.c.h.bf16 %v1135_v12  ;;  %v1140_v24 = vunpack.c.l.bf16 %v1143_v23  ;;  %v1141_v25 = vunpack.c.h.bf16 %v1143_v23  ;;  %v378_v30 = vld [vmem:[%s1567_s5] sm:$0xff]  ;;  %v379_v31 = vld [vmem:[%s1567_s5 + $0x8] sm:$0xff]  ;;  %s1083_s23 = sshll.u32 %s1367_s3, 4  ;;  %s1084_s23 = int_to_ptr.vmem [resolvable:$true] %s1083_s23 }
   0x8   :  { %1195 = vmatmul.mubr.msk.f32.vlgmr.msra.gmra.mrb[0].mxu0 %vm51_vm0, %v41_v4  ;;  %1201 = vmatprep.mubr.msk.f32.mxu1 %vm51_vm0, %v1128_v11  ;;  %v1283_v32 = vpack.c.bf16 %v379_v31, %v378_v30  ;;  %v1287_v35 = vpack.c.bf16 %v381_v34, %v380_v33  ;;  %vm142_vm7 = vcmask 24576   ;;  %v1364_v56 = vmov -1e+30   ;;  %v377_v57 = vld [vmem:[%s1568_s6] sm:$0xf]  ;;  %p1343_p1 = scmp.lt.s32.totalorder %s1084_s23, %s1084_s23 }
   0x9   :  { %1211 = vmatprep.mubr.msk.f32.mxu0 %vm51_vm0, %v1136_v13  ;;  %143 = vst.msk [vmem:[#allocation5] sm:$0x1] %vm142_vm7, %v1364_v56  ;;  %vm139_vm8 = vcmask 31744   ;;  %vm529_vm9 = vcmask 1043456   ;;  %v1365_v58 = vmov 0.0   ;;  %vm1366_vm10 = vmmov 0  }
   0xa   :  { %137 = vst.msk [vmem:[#allocation3] sm:$0xff] %vm136_vm4, %v1365_v58  ;;  %138 = vst.msk [vmem:[#allocation3 + $0x8] sm:$0xff] %vm136_vm4, %v1365_v58 }
   0xb   :  { %140 = vst.msk [vmem:[#allocation4] sm:$0xff] %vm139_vm8, %v1365_v58  ;;  %141 = vst.msk [vmem:[#allocation4 + $0x8] sm:$0xff] %vm139_vm8, %v1365_v58 }
  0xdb   :  { %v1196_v6 = vpop.f32.mrb[0].mxu0 }
  0xdc   :  { %v130_v7 = vadd.f32 %v1196_v6, %v1094_v5  ;;  %v124_v8 = vpop.f32.mrb[1].mxu0 }
  0xdd   :  { %v125_v9 = vadd.f32 %v1094_v5, %v124_v8  ;;  %v500_v8 = vlaneseq }
  0xde   :  { %135 = vst.msk [vmem:[#allocation2 + $0x8] sm:$0xff] %vm133_vm1, %v130_v7 }
  0xdf   :  { %134 = vst.msk [vmem:[#allocation2] sm:$0xff] %vm133_vm1, %v125_v9  ;;  %v501_v11 = vshrl.u32 %v500_v8, 7 }
  0xe5   :  { %v145_v14 = vld [vmem:[#allocation2 + $0x8] sm:$0xff] }
  0xe6   :  { %v1008_v15 = vld [vmem:[#allocation2] sm:$0xff] }
  0xe7   :  { %1012 = vrot.lane.b32.xlu1 %v1008_v15, %s1362_s4  ;;  %v1315_v16 = vpack.i.bf16 %v145_v14, %v1008_v15  ;;  %v1275_v17 = vpack.c.bf16 %v145_v14, %v1008_v15  ;;  %v1505_v15 = vsub.s32 0, %v501_v11 }
  0xe9   :  { %1316 = vrot.lane.b32.xlu0 %v1315_v16, %s1363_s27  ;;  %1276 = vmatprep.subr.bf16.mxu1 %v1275_v17 }
  0xea   :  { %1278 = vmatpush3.bf16.msra.mxu1 %v1275_v17 }
  0xeb   :  { %1014 = vrot.lane.b32.xlu1 %v145_v14, %s1362_s4  ;;  %1284 = vmatprep.subr.bf16.mxu1 %v1283_v32 }
  0xed   :  { %1202 = vmatmul.mubr.msk.f32.vlgmr.msra.gmra.mrb[0].mxu1 %vm51_vm0, %v1129_v19 }
  0xee   :  { %1204 = vmatprep.mubr.msk.f32.mxu1 %vm51_vm0, %v1132_v20  ;;  %1286 = vmatpush3.bf16.msra.mxu1 %v1283_v32 }
  0xef   :  { %1288 = vmatprep.subr.bf16.mxu1 %v1287_v35 }
  0xf1   :  { %1205 = vmatmul.mubr.msk.f32.gmra.mrb[2].mxu1 %vm51_vm0, %v1133_v21 }
  0xf2   :  { %1290 = vmatpush3.bf16.msra.mxu1 %v1287_v35 }
  0xf3   :  { %1239 = vmatprep.subr.mxu1 %v1365_v58 }
 0x107   :  { %703 = vxpose.xlu0.b32.start [1/4] (short) (narrow) %v1136_v13, 16  ;;  %v494_v13 = vld [vmem:[#allocation5] sm:$0x1] }
 0x10b   :  { %704 = vxpose.xlu0.b32.cont [2/4] (short) (narrow) %v1137_v22, 16 }
 0x10f   :  { %705 = vxpose.xlu0.b32.cont [3/4] (short) (narrow) %v1140_v24, 16 }
 0x113   :  { %706 = vxpose.xlu0.b32.end [4/4] (short) (narrow) %v1141_v25, 16 }
 0x15b   :  { %v1317_v26 = vpop.permute.xlu0 %1316 }
 0x15c   :  { %v1319_v27 = vunpack.i.h.bf16 %v1317_v26  ;;  %v1318_v28 = vunpack.i.l.bf16 %v1317_v26 }
 0x15e   :  { %v1279_v29 = vpack.c.bf16 %v1319_v27, %v1318_v28 }
 0x160   :  { %1280 = vmatprep.subr.bf16.mxu0 %v1279_v29 }
 0x161   :  { %1282 = vmatpush3.bf16.msra.mxu0 %v1279_v29 }
 0x162   :  { %1231 = vmatprep.subr.msk.mxu0 %vm529_vm9, %v377_v57 }
 0x164   :  { %1212 = vmatmul.mubr.msk.f32.vlgmr.msra.gmra.mrb[2].mxu0 %vm51_vm0, %v1137_v22 }
 0x165   :  { %1214 = vmatprep.mubr.msk.f32.mxu0 %vm51_vm0, %v1140_v24  ;;  %1232 = vmatpush3.msk.msra.mxu0 %vm529_vm9, %v377_v57 }
 0x168   :  { %1215 = vmatmul.mubr.msk.f32.gmra.mrb[4].mxu0 %vm51_vm0, %v1141_v25 }
 0x187   :  { %v719_v28 = vpop.trf.xlu0 }
 0x1c0   :  { %v1474_v36 = vpop.f32.mrb[0].mxu1 }
 0x1c1   :  { %v1476_v37 = vpop.f32.mrb[1].mxu1 }
 0x1c4   :  { %v1478_v38 = vpop.f32.mrb[2].mxu1 }
 0x1c5   :  { %v1480_v39 = vpop.f32.mrb[3].mxu1 }
 0x237   :  { %v1213_v40 = vpop.f32.mrb[2].mxu0 }
 0x238   :  { %v352_v41 = vadd.f32 %v1213_v40, %v1474_v36  ;;  %v346_v42 = vpop.f32.mrb[3].mxu0  ;;  %v720_v40 = vpop.trf.xlu0 }
 0x239   :  { %v347_v43 = vadd.f32 %v346_v42, %v1476_v37 }
 0x23a   :  { %v370_v44 = vmul.f32 0.2, %v352_v41  ;;  %vm366_vm2 = vcmp.gt.f32.partialorder %v352_v41, 0.0 }
 0x23b   :  { %vm365_vm3 = vcmp.gt.f32.partialorder %v347_v43, 0.0  ;;  %v369_v45 = vmul.f32 0.2, %v347_v43  ;;  %v1216_v46 = vpop.f32.mrb[4].mxu0 }
 0x23c   :  { %v362_v47 = vadd.f32 %v1216_v46, %v1478_v38  ;;  %v356_v48 = vpop.f32.mrb[5].mxu0  ;;  %v374_v51 = vsel %vm366_vm2, %v352_v41, %v370_v44 }
 0x23d   :  { %v357_v49 = vadd.f32 %v356_v48, %v1480_v39  ;;  %v373_v50 = vsel %vm365_vm3, %v347_v43, %v369_v45 }
 0x23e   :  { %v372_v52 = vmul.f32 0.2, %v362_v47  ;;  %1225 = vmatprep.mubr.msk.f32.mxu1 %vm136_vm4, %v373_v50  ;;  %vm368_vm5 = vcmp.gt.f32.partialorder %v362_v47, 0.0 }
 0x23f   :  { %vm367_vm6 = vcmp.gt.f32.partialorder %v357_v49, 0.0  ;;  %v371_v53 = vmul.f32 0.2, %v357_v49  ;;  %1226 = vmatmul.mubr.msk.f32.vlgmr.msra.gmra.mrb[4].mxu1 %vm136_vm4, %v374_v51 }
 0x240   :  { %v376_v55 = vsel %vm368_vm5, %v362_v47, %v372_v52  ;;  %1240 = vmatpush3.msk.msra.mxu1 %vm529_vm9, %v377_v57 }
 0x241   :  { %v375_v54 = vsel %vm367_vm6, %v357_v49, %v371_v53  ;;  %v821_v53 = vld [vmem:[#allocation4 + $0x8] sm:$0xff] }
 0x242   :  { %1228 = vmatprep.mubr.msk.f32.mxu1 %vm136_vm4, %v375_v54  ;;  %v820_v54 = vld [vmem:[#allocation4] sm:$0xff] }
 0x243   :  { %1229 = vmatmul.mubr.msk.f32.gmra.mrb[6].mxu1 %vm136_vm4, %v376_v55 }
 0x244   :  { %1241 = vmatprep.mubr.msk.f32.mxu1 %vm1366_vm10, %v1365_v58 }
 0x312   :  { %v1227_v59 = vpop.f32.mrb[4].mxu1 }
 0x313   :  { %v482_v60 = vsel %vm139_vm8, %v1227_v59, -inf  ;;  %v461_v61 = vpop.f32.mrb[5].mxu1 }
 0x314   :  { %v481_v62 = vsel %vm139_vm8, %v461_v61, -inf }
 0x315   :  { %v485_v63 = vmax.f32 %v481_v62, %v482_v60  ;;  %v623_v62 = vld [vmem:[#allocation3 + $0x8] sm:$0xff] }
 0x316   :  { %v1230_v0 = vpop.f32.mrb[6].mxu1 }
 0x317   :  { %v484_v1 = vsel %vm139_vm8, %v1230_v0, -inf  ;;  %v471_v2 = vpop.f32.mrb[7].mxu1 }
 0x318   :  { %v483_v3 = vsel %vm139_vm8, %v471_v2, -inf }
 0x319   :  { %v486_v4 = vmax.f32 %v483_v3, %v484_v1 }
 0x31b   :  { %v487_v5 = vmax.f32 %v485_v63, %v486_v4  ;;  %v622_v63 = vld [vmem:[#allocation3] sm:$0xff] }
 0x31d   :  { %v488_v6 = vrot.slane %v487_v5, 4 }
 0x31f   :  { %v489_v7 = vmax.f32 %v487_v5, %v488_v6 }
 0x321   :  { %v490_v9 = vrot.slane %v489_v7, 2 }
 0x323   :  { %v491_v10 = vmax.f32 %v489_v7, %v490_v9 }
 0x325   :  { %v492_v12 = vrot.slane %v491_v10, 1 }
 0x327   :  { %v493_v14 = vmax.f32 %v491_v10, %v492_v12  ;;  %v1013_v10 = vpop.permute.xlu1 %1012 }
 0x329   :  { %v495_v16 = vmax.f32 %v494_v13, %v493_v14 }
 0x32b   :  { %v496_v17 = vsub.f32 %v494_v13, %v495_v16  ;;  %v503_v18 = vrot.slane %v495_v16, %v1505_v15  ;;  %909 = vst.msk [vmem:[#allocation5] sm:$0x1] %vm142_vm7, %v495_v16 }
 0x32d   :  { %v497_v19 = vmul.f32 1.442695, %v496_v17  ;;  %v505_v20 = vsub.f32 %v461_v61, %v503_v18  ;;  %v506_v21 = vsub.f32 %v1227_v59, %v503_v18  ;;  %v507_v22 = vsub.f32 %v471_v2, %v503_v18  ;;  %v1015_v17 = vpop.permute.xlu1 %1014 }
 0x32e   :  { %v508_v23 = vsub.f32 %v1230_v0, %v503_v18  ;;  %v1123_v18 = vld [vmem:[%s1569_s7] ss:$0 sm:$0xff] }
 0x32f   :  { %1320 = vpow2.f32 %v497_v19  ;;  %v509_v24 = vmul.f32 1.442695, %v505_v20  ;;  %v511_v25 = vmul.f32 1.442695, %v506_v21  ;;  %v513_v26 = vmul.f32 1.442695, %v507_v22 }
 0x330   :  { %v515_v27 = vmul.f32 1.442695, %v508_v23 }
 0x331   :  { %1322 = vpow2.f32 %v509_v24 }
 0x332   :  { %1324 = vpow2.f32 %v511_v25 }
 0x333   :  { %1326 = vpow2.f32 %v513_v26 }
 0x334   :  { %1328 = vpow2.f32 %v515_v27 }
 0x339   :  { %v1321_v29 = vpop.eup %1320 }
 0x33a   :  { %1242 = vmatmul.mubr.msk.f32.vlgmr.msra.gmra.mrb[8].mxu1 %vm139_vm8, %v1321_v29  ;;  %v825_v51 = vrot.slane %v1321_v29, %v1505_v15 }
 0x33b   :  { %v1323_v30 = vpop.eup %1322  ;;  %1263 = vmatprep.mubr.msk.f32.mxu1 %vm136_vm4, %v719_v28 }
 0x33c   :  { %v1325_v31 = vpop.eup %1324  ;;  %1233 = vmatprep.mubr.msk.f32.mxu0 %vm139_vm8, %v1323_v30  ;;  %v828_v56 = vmul.f32 %v825_v51, %v821_v53  ;;  %v827_v57 = vmul.f32 %v825_v51, %v820_v54 }
 0x33d   :  { %v1327_v32 = vpop.eup %1326  ;;  %1234 = vmatmul.mubr.msk.f32.vlgmr.msra.gmra.mrb[6].mxu0 %vm139_vm8, %v1325_v31  ;;  %v1299_v33 = vpack.c.bf16 %v1325_v31, %v1323_v30 }
 0x33e   :  { %v1329_v34 = vpop.eup %1328  ;;  %1236 = vmatprep.mubr.msk.f32.mxu0 %vm139_vm8, %v1327_v32 }
 0x33f   :  { %1300 = vmatprep.subr.bf16.mxu1 %v1299_v33  ;;  %v1303_v35 = vpack.c.bf16 %v1329_v34, %v1327_v32 }
 0x340   :  { %1302 = vmatpush3.bf16.msra.mxu1 %v1299_v33 }
 0x341   :  { %1304 = vmatprep.subr.bf16.mxu1 %v1303_v35  ;;  %1237 = vmatmul.mubr.msk.f32.gmra.mrb[8].mxu0 %vm139_vm8, %v1329_v34 }
 0x342   :  { %1252 = vmatprep.mubr.msk.f32.mxu0 %vm136_vm4, %v719_v28 }
 0x344   :  { %1306 = vmatpush3.bf16.msra.mxu1 %v1303_v35 }
 0x347   :  { %1264 = vmatmul.mubr.msk.f32.vlgmr.msra.gmra.mrb[10].mxu1 %vm136_vm4, %v720_v40 }
 0x40d   :  { %v693_v41 = vpop.f32.mrb[8].mxu1 }
 0x40e   :  { %v1243_v42 = vpop.f32.mrb[9].mxu1  ;;  %v700_v61 = vrot.slane %v693_v41, %v1505_v15 }
 0x410   :  { %v1235_v43 = vpop.f32.mrb[6].mxu0  ;;  %v702_v0 = vmul.f32 %v700_v61, %v623_v62  ;;  %v701_v2 = vmul.f32 %v700_v61, %v622_v63 }
 0x411   :  { %v619_v44 = vmul.f32 %v1235_v43, %v1474_v36  ;;  %v599_v45 = vpop.f32.mrb[7].mxu0  ;;  %v915_v36 = vld [vmem:[%s1568_s6] sm:$0xf] }
 0x412   :  { %v618_v46 = vmul.f32 %v599_v45, %v1476_v37 }
 0x414   :  { %v1291_v47 = vpack.c.bf16 %v619_v44, %v618_v46  ;;  %v1238_v48 = vpop.f32.mrb[8].mxu0  ;;  %v1124_v46 = vld [vmem:[%s1570_s8] ss:$0 sm:$0xff]  ;;  %s1338_s8 = scalar_lea.vmem %s1084_s23, 256 }
 0x415   :  { %v621_v49 = vmul.f32 %v1238_v48, %v1478_v38  ;;  %v609_v50 = vpop.f32.mrb[9].mxu0  ;;  %v1125_v48 = vld [vmem:[%s1571_s9] ss:$0 sm:$0xff]  ;;  %p1339_p0 = scmp.ne.s32.totalorder %s1084_s23, %s1338_s8  ;;  %p1344_p2 = scmp.lt.s32.totalorder %s1338_s8, %s1338_s8 }
 0x416   :  { %v620_v52 = vmul.f32 %v609_v50, %v1480_v39  ;;  %1292 = vmatprep.subr.bf16.mxu0 %v1291_v47 }
 0x417   :  { %1294 = vmatpush3.bf16.msra.mxu0 %v1291_v47  ;;  %p1345_p3 = por %p1344_p2, %p1343_p1 }
 0x418   :  { %v1295_v55 = vpack.c.bf16 %v621_v49, %v620_v52 }
 0x419   :  { %p1346_p4 = pnand %p1345_p3, %p1339_p0 }
 0x41a   :  { %v1265_v37 = vpop.f32.mrb[10].mxu1  ;;  %1296 = vmatprep.subr.bf16.mxu0 %v1295_v55 }
 0x41b   :  { %v905_v58 = vadd.f32 %v1265_v37, %v828_v56  ;;  %v895_v38 = vpop.f32.mrb[11].mxu1  ;;  %1298 = vmatpush3.bf16.msra.mxu0 %v1295_v55 }
 0x41c   :  { %v904_v59 = vadd.f32 %v895_v38, %v827_v57  ;;  %1266 = vmatprep.subr.msk.mxu0 %vm529_vm9, %v915_v36 }
 0x41d   :  { %907 = vst.msk [vmem:[#allocation4 + $0x8] sm:$0xff] %vm139_vm8, %v905_v58 }
 0x41e   :  { %906 = vst.msk [vmem:[#allocation4] sm:$0xff] %vm139_vm8, %v904_v59  ;;  %1253 = vmatmul.mubr.msk.f32.vlgmr.msra.gmra.mrb[10].mxu0 %vm136_vm4, %v720_v40 }
 0x41f   :  { %1267 = vmatpush3.msk.msra.mxu0 %vm529_vm9, %v915_v36 }
 0x424   :  { %v914_v60 = vld [vmem:[#allocation4 + $0x8] sm:$0xff] }
 0x425   :  { %v913_v39 = vld [vmem:[#allocation4] sm:$0xff] }
 0x426   :  { %1268 = vmatprep.mubr.msk.f32.mxu0 %vm139_vm8, %v913_v39 }
 0x427   :  { %1269 = vmatmul.mubr.msk.f32.vlgmr.msra.gmra.mrb[12].mxu0 %vm139_vm8, %v914_v60 }
 0x4f1   :  { %v1254_v1 = vpop.f32.mrb[10].mxu0 }
 0x4f2   :  { %v817_v3 = vadd.f32 %v1254_v1, %v702_v0  ;;  %v807_v4 = vpop.f32.mrb[11].mxu0 }
 0x4f3   :  { %v816_v5 = vadd.f32 %v807_v4, %v701_v2 }
 0x4f4   :  { %819 = vst.msk [vmem:[#allocation3 + $0x8] sm:$0xff] %vm136_vm4, %v817_v3 }
 0x4f5   :  { %818 = vst.msk [vmem:[#allocation3] sm:$0xff] %vm136_vm4, %v816_v5 }
 0x4fa   :  { %v1270_v6 = vpop.f32.mrb[12].mxu0 }
 0x4fb   :  { %v1003_v7 = vmax.f32 %v1270_v6, 1e-20  ;;  %v991_v8 = vpop.f32.mrb[13].mxu0  ;;  %v1001_v12 = vld [vmem:[#allocation3 + $0x8] sm:$0xff] }
 0x4fc   :  { %v1002_v9 = vmax.f32 %v991_v8, 1e-20  ;;  %v1000_v14 = vld [vmem:[#allocation3] sm:$0xff] }
 0x4fd   :  { %1330 = vrcp.f32 %v1003_v7 }
 0x4fe   :  { %1332 = vrcp.f32 %v1002_v9 }
 0x507   :  { %v1331_v11 = vpop.eup %1330 }
 0x508   :  { %v1333_v13 = vpop.eup %1332  ;;  %v1007_v15 = vmul.f32 %v1331_v11, %v1001_v12 }
 0x509   :  { %v1005_v16 = vmul.f32 %v1333_v13, %v1000_v14 }
 0x50a   :  { %v1019_v20 = vadd.f32 %v1015_v17, %v1007_v15 }
 0x50b   :  { %v1018_v19 = vadd.f32 %v1013_v10, %v1005_v16 }
 0x50c   :  { %v1028_v23 = vadd.f32 %v1123_v18, %v1019_v20 }
 0x50d   :  { %v1027_v21 = vadd.f32 %v1123_v18, %v1018_v19 }
 0x50e   :  { %v1034_v24 = vsel %vm136_vm4, %v1028_v23, 0.0 }
 0x50f   :  { %v1031_v22 = vsel %vm136_vm4, %v1027_v21, 0.0 }
 0x510   :  { %1032 = vadd.xlane.f32.xlu1 %v1031_v22 }
 0x514   :  { %1035 = vadd.xlane.f32.xlu1 %v1034_v24 }
 0x59d   :  { %v1033_v25 = vpop.xlane.xlu1 %1032 }
 0x59e   :  { %v1038_v26 = vmul.f32 0.03125, %v1033_v25 }
 0x5a0   :  { %v1040_v27 = vsub.f32 %v1027_v21, %v1038_v26 }
 0x5a1   :  { %v1036_v28 = vpop.xlane.xlu1 %1035 }
 0x5a2   :  { %v1039_v29 = vmul.f32 0.03125, %v1036_v28  ;;  %v1042_v30 = vmul.f32 %v1040_v27, %v1040_v27 }
 0x5a4   :  { %v1041_v31 = vsub.f32 %v1028_v23, %v1039_v29  ;;  %v1044_v32 = vsel %vm136_vm4, %v1042_v30, 0.0 }
 0x5a5   :  { %1045 = vadd.xlane.f32.xlu0 %v1044_v32 }
 0x5a6   :  { %v1043_v33 = vmul.f32 %v1041_v31, %v1041_v31 }
 0x5a8   :  { %v1047_v34 = vsel %vm136_vm4, %v1043_v33, 0.0 }
 0x5a9   :  { %1048 = vadd.xlane.f32.xlu1 %v1047_v34 }
 0x632   :  { %v1046_v35 = vpop.xlane.xlu0 %1045 }
 0x633   :  { %v1050_v40 = vmul.f32 0.03125, %v1046_v35 }
 0x635   :  { %v1052_v41 = vadd.f32 1e-05, %v1050_v40 }
 0x636   :  { %v1049_v42 = vpop.xlane.xlu1 %1048 }
 0x637   :  { %1334 = vrsqrt.f32 %v1052_v41  ;;  %v1051_v43 = vmul.f32 0.03125, %v1049_v42 }
 0x639   :  { %v1053_v44 = vadd.f32 1e-05, %v1051_v43 }
 0x63b   :  { %1336 = vrsqrt.f32 %v1053_v44 }
 0x641   :  { %v1335_v45 = vpop.eup %1334 }
 0x642   :  { %v1056_v47 = vmul.f32 %v1335_v45, %v1040_v27 }
 0x644   :  { %v1064_v49 = vmul.f32 %v1124_v46, %v1056_v47 }
 0x645   :  { %v1337_v50 = vpop.eup %1336 }
 0x646   :  { %v1057_v51 = vmul.f32 %v1337_v50, %v1041_v31  ;;  %v1072_v52 = vadd.f32 %v1125_v48, %v1064_v49 }
 0x648   :  { %v1065_v53 = vmul.f32 %v1124_v46, %v1057_v51  ;;  %v1074_v54 = vmax.f32 %v1072_v52, 0.0 }
 0x64a   :  { %v1073_v55 = vadd.f32 %v1125_v48, %v1065_v53  ;;  %1076 = vst.msk [vmem:[#allocation6] sm:$0xff] %vm136_vm4, %v1074_v54 }
 0x64c   :  { %v1075_v56 = vmax.f32 %v1073_v55, 0.0 }
 0x64e   :  { %1077 = vst.msk [vmem:[#allocation6 + $0x8] sm:$0xff] %vm136_vm4, %v1075_v56 }
 0x64f   :  { %1349 = shalt.err (!%p1346_p4)
}
 0x650   :  { %s1350_s0 = scalar_lea.hbm %s1572_s10, 256 }
 0x651   :  { %p1351_p5 = scmp.ne.s32.totalorder %s1572_s10, %s1350_s0  ;;  %p1354_p6 = scmp.lt.u32.totalorder %s1350_s0, %s1572_s10 }
 0x653   :  { %p1356_p7 = pnand %p1354_p6, %p1351_p5 }
 0x655   :  { %1359 = shalt.err (!%p1356_p7)
}
 0x656   :  { %s1368_s28 = smov 128   ;;  %s1369_s29 = smov 8  }
 0x657   :  { %1089 = dma.vmem_to_hbm [thread:$0]  %s1084_s23, 256, %s1572_s10, [#allocation7], %s1368_s28, %s1368_s28, %s1369_s29  }
 0x658   :  { %1360 = dma.done.wait [#allocation7], 256  }
 0x659   :  { %1361 = vsyncadd [#allocation7], 4294967040 }
 0x65a   :  { %1093 = vsyncpa [#allocation7], 1 }

</bundles_post_ra>
